<compile_context>
chip_gen: v7x
topology: tpu7x:2x2x1
jax: 0.10.0
libtpu: 0.0.40
codegen_flags: <defaults>
</compile_context>

<pallas_src>
import functools

import jax
import jax.numpy as jnp
from jax.experimental import pallas as pl
from jax.experimental.pallas import tpu as pltpu


def _round_up(x, m):
    return (x + m - 1) // m * m


# ----------------------------------------------------------------------------
# Phase 1: embedding gather + ReLU + batched input-gate GEMM + serial GRU
# ----------------------------------------------------------------------------
def _make_gru_kernel(T, Tp, Hp):
    def kernel(tok_ref,        # SMEM scalar prefetch: (T,) int32
               emb_hbm,        # HBM (pl.ANY): (O, 1, Hp) f32 embedding table
               wih_ref,        # VMEM (Hp, 3Hp) bf16  W_ih^T (gate-padded)
               whh_ref,        # VMEM (Hp, 3Hp) bf16  W_hh^T (gate-padded)
               bih_ref,        # VMEM (1, 3Hp)  f32
               bhh_ref,        # VMEM (1, 3Hp)  f32
               h0_ref,         # VMEM (1, Hp)   f32   initial hidden
               hall_ref,       # out  (Tp, Hp)  f32   all hidden states
               hlast_ref,      # out  (1, Hp)   f32   final hidden
               x_all,          # scratch VMEM (Tp, Hp)  f32  embedded tokens
               gi_buf,         # scratch VMEM (Tp, 3Hp) f32  input-gate GEMM
               h_state,        # scratch VMEM (1, Hp)   f32  carried hidden
               dma_sems):      # scratch DMA sems (Tp,)
        # 1) Gather all T embedding rows from HBM; issue everything first so
        #    the gathers overlap each other (latency hidden behind issue).
        @pl.loop(0, T)
        def _issue(t):
            tok = tok_ref[t]
            pltpu.make_async_copy(
                emb_hbm.at[tok], x_all.at[pl.ds(t, 1)], dma_sems.at[t]).start()

        @pl.loop(0, T)
        def _wait(t):
            tok = tok_ref[t]
            pltpu.make_async_copy(
                emb_hbm.at[tok], x_all.at[pl.ds(t, 1)], dma_sems.at[t]).wait()

        if Tp > T:  # keep pad rows deterministic (zero) for the GEMM below
            x_all[pl.ds(T, Tp - T), :] = jnp.zeros((Tp - T, Hp), x_all.dtype)

        # 2) Input-to-hidden half hoisted OFF the serial path:
        #    gi_all = relu(E[tok]) @ W_ih^T + b_ih  as one real GEMM.
        x = jnp.maximum(x_all[...], 0.0)                       # ReLU, f32
        gi_buf[...] = jnp.dot(x.astype(jnp.bfloat16), wih_ref[...],
                              preferred_element_type=jnp.float32) + bih_ref[...]

        # 3) Serial recurrence: only the W_hh matmul remains on the critical
        #    path.  PyTorch gate order r, z, n; each gate padded to Hp lanes.
        h_state[...] = h0_ref[...]

        @pl.loop(0, T)
        def _step(t):
            h = h_state[...]                                   # f32 (1, Hp)
            gh = jnp.dot(h.astype(jnp.bfloat16), whh_ref[...],
                         preferred_element_type=jnp.float32) + bhh_ref[...]
            gi = gi_buf[pl.ds(t, 1), :]
            r = jax.nn.sigmoid(gi[:, 0:Hp] + gh[:, 0:Hp])
            z = jax.nn.sigmoid(gi[:, Hp:2 * Hp] + gh[:, Hp:2 * Hp])
            n = jnp.tanh(gi[:, 2 * Hp:3 * Hp] + r * gh[:, 2 * Hp:3 * Hp])
            h_new = (1.0 - z) * n + z * h
            h_state[...] = h_new
            hall_ref[pl.ds(t, 1), :] = h_new

        if Tp > T:
            hall_ref[pl.ds(T, Tp - T), :] = jnp.zeros((Tp - T, Hp),
                                                      hall_ref.dtype)
        hlast_ref[...] = h_state[...]

    return kernel


# ----------------------------------------------------------------------------
# Phase 2: time-batched, vocab-tiled output projection (raw logits)
# ----------------------------------------------------------------------------
def _proj_kernel(h_ref, w_ref, b_ref, out_ref):
    # (Tp, Hp) bf16 @ (Hp, O_tile) bf16 -> (Tp, O_tile) f32, + bias
    out_ref[...] = jnp.dot(h_ref[...], w_ref[...],
                           preferred_element_type=jnp.float32) + b_ref[...]


@functools.partial(jax.jit, static_argnames=("hidden_size", "output_size"))
def decoder_rnn_decode(tokens, hidden, params, *, hidden_size, output_size):
    """T teacher-forced DecoderRNN steps.

    tokens : (T,) int32 token ids
    hidden : (1, 1, H) f32 initial hidden state
    returns (log_probs (T, O), final_hidden (1, 1, H))
    """
    H, O = hidden_size, output_size
    T = int(tokens.shape[0])

    Tp = _round_up(max(T, 1), 8)
    Hp = _round_up(max(H, 1), 128)
    O128 = _round_up(max(O, 1), 128)
    O_tile = min(2048, O128)                 # bound per-tile W_out^T VMEM
    Op = _round_up(O128, O_tile)
    num_j = Op // O_tile

    f32, bf16 = jnp.float32, jnp.bfloat16
    toks = tokens.astype(jnp.int32).reshape((T,))

    # ---- pack / pad / cast parameters (all padding is exact zeros) ---------
    emb = jnp.zeros((O, 1, Hp), f32).at[:, 0, :H].set(
        params["embedding"].astype(f32))

    def pad_gate_weight(w):                  # (3H, H) -> (Hp, 3Hp), transposed
        w3 = jnp.transpose(w.astype(bf16).reshape(3, H, H), (0, 2, 1))
        out = jnp.zeros((3, Hp, Hp), bf16).at[:, :H, :H].set(w3)
        return jnp.transpose(out, (1, 0, 2)).reshape(Hp, 3 * Hp)

    def pad_gate_bias(b):                    # (3H,) -> (1, 3Hp)
        out = jnp.zeros((3, Hp), f32).at[:, :H].set(b.astype(f32).reshape(3, H))
        return out.reshape(1, 3 * Hp)

    wih = pad_gate_weight(params["gru_w_ih"])
    whh = pad_gate_weight(params["gru_w_hh"])
    bih = pad_gate_bias(params["gru_b_ih"])
    bhh = pad_gate_bias(params["gru_b_hh"])
    wout = jnp.zeros((Hp, Op), bf16).at[:H, :O].set(params["out_w"].astype(bf16).T)
    bout = jnp.zeros((1, Op), f32).at[0, :O].set(params["out_b"].astype(f32))
    h0 = jnp.zeros((1, Hp), f32).at[:, :H].set(hidden.reshape(1, H).astype(f32))

    vmem_limit = 48 * 1024 * 1024            # headroom on v7x (64 MiB physical)

    # ---- phase 1: GRU recurrence ------------------------------------------
    def _once(shape):  # fetched exactly once -> single-buffered
        return pl.BlockSpec(shape, lambda i, tok: tuple(0 for _ in shape),
                            pipeline_mode=pl.Buffered(1))

    gru_kernel = _make_gru_kernel(T, Tp, Hp)
    h_all, h_last = pl.pallas_call(
        gru_kernel,
        out_shape=(jax.ShapeDtypeStruct((Tp, Hp), f32),
                   jax.ShapeDtypeStruct((1, Hp), f32)),
        grid_spec=pltpu.PrefetchScalarGridSpec(
            num_scalar_prefetch=1,
            grid=(1,),
            in_specs=[
                pl.BlockSpec(memory_space=pl.ANY),     # embedding table (HBM)
                _once((Hp, 3 * Hp)),                   # W_ih^T
                _once((Hp, 3 * Hp)),                   # W_hh^T
                _once((1, 3 * Hp)),                    # b_ih
                _once((1, 3 * Hp)),                    # b_hh
                _once((1, Hp)),                        # h0
            ],
            out_specs=(pl.BlockSpec((Tp, Hp), lambda i, tok: (0, 0)),
                       pl.BlockSpec((1, Hp), lambda i, tok: (0, 0))),
            scratch_shapes=[
                pltpu.VMEM((Tp, Hp), f32),             # embedded token rows
                pltpu.VMEM((Tp, 3 * Hp), f32),         # precomputed input gates
                pltpu.VMEM((1, Hp), f32),              # carried hidden state
                pltpu.SemaphoreType.DMA((Tp,)),        # per-row gather sems
            ],
        ),
        compiler_params=pltpu.CompilerParams(
            dimension_semantics=("arbitrary",),
            vmem_limit_bytes=vmem_limit,
        ),
    )(toks, emb, wih, whh, bih, bhh, h0)

    # ---- phase 2: vocab-tiled, time-batched projection ---------------------
    h_all_bf = h_all.astype(bf16)
    logits_full = pl.pallas_call(
        _proj_kernel,
        out_shape=jax.ShapeDtypeStruct((Tp, Op), f32),
        grid=(num_j,),
        in_specs=[
            pl.BlockSpec((Tp, Hp), lambda j: (0, 0)),          # hidden slab
            pl.BlockSpec((Hp, O_tile), lambda j: (0, j)),      # W_out^T tile
            pl.BlockSpec((1, O_tile), lambda j: (0, j)),       # bias tile
        ],
        out_specs=pl.BlockSpec((Tp, O_tile), lambda j: (0, j)),
        compiler_params=pltpu.CompilerParams(
            dimension_semantics=("parallel",),                 # megacore on v7x
            vmem_limit_bytes=vmem_limit,
        ),
    )(h_all_bf, wout, bout)

    # Final LogSoftmax outside the kernel (per review): cheap XLA op on the
    # stripped (T, O) logits, keeps the vocab grid axis parallel.
    logits = logits_full[:T, :O]
    logp = jax.nn.log_softmax(logits, axis=-1)
    h_out = h_last[:, :H].reshape(1, 1, H)
    return logp, h_out


def decoder_rnn_step(token, hidden, params, *, hidden_size, output_size):
    """One DecoderRNN.forward step (matches the PyTorch module exactly)."""
    tokens = jnp.asarray(token, jnp.int32).reshape((1,))
    logp, h_new = decoder_rnn_decode(tokens, hidden, params,
                                     hidden_size=hidden_size,
                                     output_size=output_size)
    return logp, h_new


def init_params(key, hidden_size, output_size):
    """Deterministic synthetic parameters matching PyTorch module shapes."""
    H, O = hidden_size, output_size
    ks = jax.random.split(key, 7)
    bound = 1.0 / jnp.sqrt(H)
    u = lambda k, shape: jax.random.uniform(k, shape, jnp.float32, -bound, bound)
    return {
        "embedding": jax.random.normal(ks[0], (O, H), jnp.float32),
        "gru_w_ih": u(ks[1], (3 * H, H)),
        "gru_w_hh": u(ks[2], (3 * H, H)),
        "gru_b_ih": u(ks[3], (3 * H,)),
        "gru_b_hh": u(ks[4], (3 * H,)),
        "out_w": u(ks[5], (O, H)),
        "out_b": u(ks[6], (O,)),
    }


def _reference_decode(tokens, hidden, params, hidden_size, output_size):
    """Pure-JAX reference of the PyTorch forward, mirroring the kernel's bf16
    weight/activation rounding (f32 accumulation, f32 hidden carry)."""
    H = hidden_size
    bf = lambda a: a.astype(jnp.bfloat16).astype(jnp.float32)
    emb = params["embedding"].astype(jnp.float32)
    w_ih, w_hh, w_out = bf(params["gru_w_ih"]), bf(params["gru_w_hh"]), bf(params["out_w"])
    b_ih = params["gru_b_ih"].astype(jnp.float32)
    b_hh = params["gru_b_hh"].astype(jnp.float32)
    b_out = params["out_b"].astype(jnp.float32)

    h = hidden.reshape(1, H).astype(jnp.float32)
    outs = []
    for i in range(int(tokens.shape[0])):
        x = jnp.maximum(emb[tokens[i]].reshape(1, H), 0.0)
        gi = bf(x) @ w_ih.T + b_ih
        gh = bf(h) @ w_hh.T + b_hh
        r = jax.nn.sigmoid(gi[:, :H] + gh[:, :H])
        z = jax.nn.sigmoid(gi[:, H:2 * H] + gh[:, H:2 * H])
        n = jnp.tanh(gi[:, 2 * H:] + r * gh[:, 2 * H:])
        h = (1.0 - z) * n + z * h
        logits = bf(h) @ w_out.T + b_out
        outs.append(jax.nn.log_softmax(logits, axis=1))
    return jnp.concatenate(outs, axis=0), h.reshape(1, 1, H)


if __name__ == "__main__":
    hidden_size = 32
    output_size = 64

    key = jax.random.PRNGKey(0)
    params = init_params(key, hidden_size, output_size)

    # --- single step: the PyTorch module's forward() -------------------------
    token = jnp.array(5, jnp.int32)
    hidden = jnp.zeros((1, 1, hidden_size), jnp.float32)   # initHidden()

    logp, h_new = decoder_rnn_step(token, hidden, params,
                                   hidden_size=hidden_size,
                                   output_size=output_size)
    jax.block_until_ready((logp, h_new))

    ref_logp, ref_h = _reference_decode(jnp.array([5], jnp.int32), hidden, params,
                                        hidden_size, output_size)
    assert logp.shape == (1, output_size)
    assert h_new.shape == (1, 1, hidden_size)
    assert jnp.allclose(logp, ref_logp, atol=2e-3, rtol=2e-3)
    assert jnp.allclose(h_new, ref_h, atol=2e-3, rtol=2e-3)

    # --- fused multi-step (teacher-forced) decode -----------------------------
    tokens = jnp.array([5, 1, 17, 42], jnp.int32)
    logp_seq, h_seq = decoder_rnn_decode(tokens, hidden, params,
                                         hidden_size=hidden_size,
                                         output_size=output_size)
    jax.block_until_ready((logp_seq, h_seq))

    ref_logp_seq, ref_h_seq = _reference_decode(tokens, hidden, params,
                                                hidden_size, output_size)
    assert logp_seq.shape == (tokens.shape[0], output_size)
    assert h_seq.shape == (1, 1, hidden_size)
    assert jnp.allclose(logp_seq, ref_logp_seq, atol=2e-3, rtol=2e-3)
    assert jnp.allclose(h_seq, ref_h_seq, atol=2e-3, rtol=2e-3)

    print("KERNEL_OK")
</pallas_src>

<mosaic_0001>
module attributes {stable_mosaic.version = 11 : i64} {
  func.func @kernel(%arg0: i32, %arg1: memref<1xi32, #tpu.memory_space<smem>>, %arg2: memref<64x1x128xf32, #tpu.memory_space<any>>, %arg3: memref<128x384xbf16, #tpu.memory_space<vmem>>, %arg4: memref<128x384xbf16, #tpu.memory_space<vmem>>, %arg5: memref<1x384xf32, #tpu.memory_space<vmem>>, %arg6: memref<1x384xf32, #tpu.memory_space<vmem>>, %arg7: memref<1x128xf32, #tpu.memory_space<vmem>>, %arg8: memref<8x128xf32, #tpu.memory_space<vmem>>, %arg9: memref<1x128xf32, #tpu.memory_space<vmem>>, %arg10: memref<8x128xf32, #tpu.memory_space<vmem>>, %arg11: memref<8x384xf32, #tpu.memory_space<vmem>>, %arg12: memref<1x128xf32, #tpu.memory_space<vmem>>, %arg13: memref<8x!tpu.dma_semaphore, #tpu.memory_space<semaphore_mem>>) attributes {dimension_semantics = [#tpu.dimension_semantics<arbitrary>], iteration_bounds = array<i64: 1>, scalar_prefetch = 1 : i64, scratch_operands = 4 : i64, tpu.core_type = #tpu.core_type<tc>, window_params = [{}, {pipeline_mode = #tpu.pipeline_mode<synchronous>, transform_indices = @transform_1, window_bounds = array<i64: 128, 384>}, {pipeline_mode = #tpu.pipeline_mode<synchronous>, transform_indices = @transform_2, window_bounds = array<i64: 128, 384>}, {pipeline_mode = #tpu.pipeline_mode<synchronous>, transform_indices = @transform_3, window_bounds = array<i64: 1, 384>}, {pipeline_mode = #tpu.pipeline_mode<synchronous>, transform_indices = @transform_4, window_bounds = array<i64: 1, 384>}, {pipeline_mode = #tpu.pipeline_mode<synchronous>, transform_indices = @transform_5, window_bounds = array<i64: 1, 128>}, {pipeline_mode = #tpu.pipeline_mode<synchronous>, transform_indices = @transform_6, window_bounds = array<i64: 8, 128>}, {pipeline_mode = #tpu.pipeline_mode<synchronous>, transform_indices = @transform_7, window_bounds = array<i64: 1, 128>}]} {
    %c0_i32 = arith.constant 0 : i32
    %c1_i32 = arith.constant 1 : i32
    %0 = arith.muli %c0_i32, %c1_i32 : i32
    %c0_i32_0 = arith.constant 0 : i32
    %1 = arith.addi %c0_i32_0, %0 : i32
    %2 = arith.index_cast %1 : i32 to index
    %3 = memref.load %arg1[%2] : memref<1xi32, #tpu.memory_space<smem>>
    %c0_i32_1 = arith.constant 0 : i32
    %c0_i32_2 = arith.constant 0 : i32
    %4 = tpu.memref_slice %arg2[%3, %c0_i32_1, %c0_i32_2] : memref<64x1x128xf32, #tpu.memory_space<any>> -> memref<1x1x128xf32, #tpu.memory_space<any>>
    %5 = tpu.memref_squeeze %4 : memref<1x1x128xf32, #tpu.memory_space<any>> -> memref<1x128xf32, #tpu.memory_space<any>>
    %c0_i32_3 = arith.constant 0 : i32
    %6 = tpu.memref_slice %arg10[%1, %c0_i32_3] : memref<8x128xf32, #tpu.memory_space<vmem>> -> memref<1x128xf32, #tpu.memory_space<vmem>>
    %7 = tpu.memref_slice %arg13[%1] : memref<8x!tpu.dma_semaphore, #tpu.memory_space<semaphore_mem>> -> memref<1x!tpu.dma_semaphore, #tpu.memory_space<semaphore_mem>>
    %8 = tpu.memref_squeeze %7 : memref<1x!tpu.dma_semaphore, #tpu.memory_space<semaphore_mem>> -> memref<!tpu.dma_semaphore, #tpu.memory_space<semaphore_mem>>
    tpu.enqueue_dma source(%5 : memref<1x128xf32, #tpu.memory_space<any>>) target(%6 : memref<1x128xf32, #tpu.memory_space<vmem>>) target_semaphore(%8 : memref<!tpu.dma_semaphore, #tpu.memory_space<semaphore_mem>>)
    %c1_i32_4 = arith.constant 1 : i32
    %c0_i32_5 = arith.constant 0 : i32
    %c1_i32_6 = arith.constant 1 : i32
    %9 = arith.muli %c0_i32_5, %c1_i32_6 : i32
    %c0_i32_7 = arith.constant 0 : i32
    %10 = arith.addi %c0_i32_7, %9 : i32
    %11 = arith.index_cast %10 : i32 to index
    %12 = memref.load %arg1[%11] : memref<1xi32, #tpu.memory_space<smem>>
    %c0_i32_8 = arith.constant 0 : i32
    %c0_i32_9 = arith.constant 0 : i32
    %13 = tpu.memref_slice %arg2[%12, %c0_i32_8, %c0_i32_9] : memref<64x1x128xf32, #tpu.memory_space<any>> -> memref<1x1x128xf32, #tpu.memory_space<any>>
    %14 = tpu.memref_squeeze %13 : memref<1x1x128xf32, #tpu.memory_space<any>> -> memref<1x128xf32, #tpu.memory_space<any>>
    %c0_i32_10 = arith.constant 0 : i32
    %15 = tpu.memref_slice %arg10[%10, %c0_i32_10] : memref<8x128xf32, #tpu.memory_space<vmem>> -> memref<1x128xf32, #tpu.memory_space<vmem>>
    %16 = tpu.memref_slice %arg13[%10] : memref<8x!tpu.dma_semaphore, #tpu.memory_space<semaphore_mem>> -> memref<1x!tpu.dma_semaphore, #tpu.memory_space<semaphore_mem>>
    %17 = tpu.memref_squeeze %16 : memref<1x!tpu.dma_semaphore, #tpu.memory_space<semaphore_mem>> -> memref<!tpu.dma_semaphore, #tpu.memory_space<semaphore_mem>>
    tpu.wait_dma2 semaphore(%17 : memref<!tpu.dma_semaphore, #tpu.memory_space<semaphore_mem>>) src(%14 : memref<1x128xf32, #tpu.memory_space<any>>) dst(%15 : memref<1x128xf32, #tpu.memory_space<vmem>>)
    %c1_i32_11 = arith.constant 1 : i32
    %cst = arith.constant 0.000000e+00 : f32
    %18 = vector.broadcast %cst : f32 to vector<7x128xf32>
    %c1 = arith.constant 1 : index
    %c0 = arith.constant 0 : index
    %19 = vector.load %arg10[%c1, %c0] : memref<8x128xf32, #tpu.memory_space<vmem>>, vector<7x128xf32>
    tpu.vector_store %arg10[%c1, %c0], %18 {strides = array<i32>} : memref<8x128xf32, #tpu.memory_space<vmem>>, vector<7x128xf32>,
    %c0_12 = arith.constant 0 : index
    %c0_13 = arith.constant 0 : index
    %20 = vector.load %arg10[%c0_12, %c0_13] : memref<8x128xf32, #tpu.memory_space<vmem>>, vector<8x128xf32>
    %cst_14 = arith.constant 0.000000e+00 : f32
    %21 = vector.broadcast %cst_14 : f32 to vector<8x128xf32>
    %22 = arith.maximumf %20, %21 : vector<8x128xf32>
    %23 = arith.truncf %22 : vector<8x128xf32> to vector<8x128xbf16>
    %c0_15 = arith.constant 0 : index
    %c0_16 = arith.constant 0 : index
    %24 = vector.load %arg3[%c0_15, %c0_16] : memref<128x384xbf16, #tpu.memory_space<vmem>>, vector<128x384xbf16>
    %cst_17 = arith.constant dense<0.000000e+00> : vector<8x384xf32>
    %25 = tpu.matmul %23, %24, %cst_17 {dimension_numbers = #tpu.dot_dimension_numbers<[1], [0], [0], [1], [0, 0, 1, 1], [], []>} : vector<8x128xbf16>, vector<128x384xbf16>, vector<8x384xf32> -> vector<8x384xf32>
    %c0_18 = arith.constant 0 : index
    %c0_19 = arith.constant 0 : index
    %26 = vector.load %arg5[%c0_18, %c0_19] : memref<1x384xf32, #tpu.memory_space<vmem>>, vector<1x384xf32>
    %27 = vector.broadcast %26 : vector<1x384xf32> to vector<8x384xf32>
    %28 = arith.addf %25, %27 : vector<8x384xf32>
    %c0_20 = arith.constant 0 : index
    %c0_21 = arith.constant 0 : index
    %29 = vector.load %arg11[%c0_20, %c0_21] : memref<8x384xf32, #tpu.memory_space<vmem>>, vector<8x384xf32>
    tpu.vector_store %arg11[%c0_20, %c0_21], %28 {strides = array<i32>} : memref<8x384xf32, #tpu.memory_space<vmem>>, vector<8x384xf32>,
    %c0_22 = arith.constant 0 : index
    %c0_23 = arith.constant 0 : index
    %30 = vector.load %arg7[%c0_22, %c0_23] : memref<1x128xf32, #tpu.memory_space<vmem>>, vector<1x128xf32>
    %c0_24 = arith.constant 0 : index
    %c0_25 = arith.constant 0 : index
    %31 = vector.load %arg12[%c0_24, %c0_25] : memref<1x128xf32, #tpu.memory_space<vmem>>, vector<1x128xf32>
    tpu.vector_store %arg12[%c0_24, %c0_25], %30 {strides = array<i32>} : memref<1x128xf32, #tpu.memory_space<vmem>>, vector<1x128xf32>,
    %c0_i32_26 = arith.constant 0 : i32
    %c1_i32_27 = arith.constant 1 : i32
    %32 = arith.muli %c0_i32_26, %c1_i32_27 : i32
    %c0_i32_28 = arith.constant 0 : i32
    %33 = arith.addi %c0_i32_28, %32 : i32
    %c0_29 = arith.constant 0 : index
    %c0_30 = arith.constant 0 : index
    %34 = vector.load %arg12[%c0_29, %c0_30] : memref<1x128xf32, #tpu.memory_space<vmem>>, vector<1x128xf32>
    %35 = arith.truncf %34 : vector<1x128xf32> to vector<1x128xbf16>
    %c0_31 = arith.constant 0 : index
    %c0_32 = arith.constant 0 : index
    %36 = vector.load %arg4[%c0_31, %c0_32] : memref<128x384xbf16, #tpu.memory_space<vmem>>, vector<128x384xbf16>
    %cst_33 = arith.constant dense<0.000000e+00> : vector<1x384xf32>
    %37 = tpu.matmul %35, %36, %cst_33 {dimension_numbers = #tpu.dot_dimension_numbers<[1], [0], [0], [1], [0, 0, 1, 1], [], []>} : vector<1x128xbf16>, vector<128x384xbf16>, vector<1x384xf32> -> vector<1x384xf32>
    %c0_34 = arith.constant 0 : index
    %c0_35 = arith.constant 0 : index
    %38 = vector.load %arg6[%c0_34, %c0_35] : memref<1x384xf32, #tpu.memory_space<vmem>>, vector<1x384xf32>
    %39 = arith.addf %37, %38 : vector<1x384xf32>
    %40 = arith.index_cast %33 : i32 to index
    %c0_36 = arith.constant 0 : index
    %41 = vector.load %arg11[%40, %c0_36] : memref<8x384xf32, #tpu.memory_space<vmem>>, vector<1x384xf32>
    %42 = vector.extract_strided_slice %41 {offsets = [0, 0], sizes = [1, 128], strides = [1, 1]} : vector<1x384xf32> to vector<1x128xf32>
    %43 = vector.extract_strided_slice %39 {offsets = [0, 0], sizes = [1, 128], strides = [1, 1]} : vector<1x384xf32> to vector<1x128xf32>
    %44 = arith.addf %42, %43 : vector<1x128xf32>
    %45 = arith.negf %44 : vector<1x128xf32>
    %46 = math.exp %45 : vector<1x128xf32>
    %cst_37 = arith.constant 1.000000e+00 : f32
    %47 = vector.broadcast %cst_37 : f32 to vector<1x128xf32>
    %48 = arith.addf %47, %46 : vector<1x128xf32>
    %49 = arith.divf %47, %48 : vector<1x128xf32>
    %50 = vector.extract_strided_slice %41 {offsets = [0, 128], sizes = [1, 128], strides = [1, 1]} : vector<1x384xf32> to vector<1x128xf32>
    %51 = vector.extract_strided_slice %39 {offsets = [0, 128], sizes = [1, 128], strides = [1, 1]} : vector<1x384xf32> to vector<1x128xf32>
    %52 = arith.addf %50, %51 : vector<1x128xf32>
    %53 = arith.negf %52 : vector<1x128xf32>
    %54 = math.exp %53 : vector<1x128xf32>
    %cst_38 = arith.constant 1.000000e+00 : f32
    %55 = vector.broadcast %cst_38 : f32 to vector<1x128xf32>
    %56 = arith.addf %55, %54 : vector<1x128xf32>
    %57 = arith.divf %55, %56 : vector<1x128xf32>
    %58 = vector.extract_strided_slice %41 {offsets = [0, 256], sizes = [1, 128], strides = [1, 1]} : vector<1x384xf32> to vector<1x128xf32>
    %59 = vector.extract_strided_slice %39 {offsets = [0, 256], sizes = [1, 128], strides = [1, 1]} : vector<1x384xf32> to vector<1x128xf32>
    %60 = arith.mulf %49, %59 : vector<1x128xf32>
    %61 = arith.addf %58, %60 : vector<1x128xf32>
    %62 = math.tanh %61 : vector<1x128xf32>
    %cst_39 = arith.constant 1.000000e+00 : f32
    %63 = vector.broadcast %cst_39 : f32 to vector<1x128xf32>
    %64 = arith.subf %63, %57 : vector<1x128xf32>
    %65 = arith.mulf %64, %62 : vector<1x128xf32>
    %66 = arith.mulf %57, %34 : vector<1x128xf32>
    %67 = arith.addf %65, %66 : vector<1x128xf32>
    %c0_40 = arith.constant 0 : index
    %c0_41 = arith.constant 0 : index
    %68 = vector.load %arg12[%c0_40, %c0_41] : memref<1x128xf32, #tpu.memory_space<vmem>>, vector<1x128xf32>
    tpu.vector_store %arg12[%c0_40, %c0_41], %67 {strides = array<i32>} : memref<1x128xf32, #tpu.memory_space<vmem>>, vector<1x128xf32>,
    %69 = arith.index_cast %33 : i32 to index
    %c0_42 = arith.constant 0 : index
    %70 = vector.load %arg8[%69, %c0_42] : memref<8x128xf32, #tpu.memory_space<vmem>>, vector<1x128xf32>
    tpu.vector_store %arg8[%69, %c0_42], %67 {strides = array<i32>} : memref<8x128xf32, #tpu.memory_space<vmem>>, vector<1x128xf32>,
    %c1_i32_43 = arith.constant 1 : i32
    %cst_44 = arith.constant 0.000000e+00 : f32
    %71 = vector.broadcast %cst_44 : f32 to vector<7x128xf32>
    %c1_45 = arith.constant 1 : index
    %c0_46 = arith.constant 0 : index
    %72 = vector.load %arg8[%c1_45, %c0_46] : memref<8x128xf32, #tpu.memory_space<vmem>>, vector<7x128xf32>
    tpu.vector_store %arg8[%c1_45, %c0_46], %71 {strides = array<i32>} : memref<8x128xf32, #tpu.memory_space<vmem>>, vector<7x128xf32>,
    %c0_47 = arith.constant 0 : index
    %c0_48 = arith.constant 0 : index
    %73 = vector.load %arg12[%c0_47, %c0_48] : memref<1x128xf32, #tpu.memory_space<vmem>>, vector<1x128xf32>
    %c0_49 = arith.constant 0 : index
    %c0_50 = arith.constant 0 : index
    %74 = vector.load %arg9[%c0_49, %c0_50] : memref<1x128xf32, #tpu.memory_space<vmem>>, vector<1x128xf32>
    tpu.vector_store %arg9[%c0_49, %c0_50], %73 {strides = array<i32>} : memref<1x128xf32, #tpu.memory_space<vmem>>, vector<1x128xf32>,
    return
  }
  func.func @transform_1(%arg0: i32, %arg1: memref<1xi32, #tpu.memory_space<smem>>) -> (i32, i32) {
    %c0_i32 = arith.constant 0 : i32
    %c0_i32_0 = arith.constant 0 : i32
    %c0_i32_1 = arith.constant 0 : i32
    return %c0_i32, %c0_i32_0 : i32, i32
  }
  func.func @transform_2(%arg0: i32, %arg1: memref<1xi32, #tpu.memory_space<smem>>) -> (i32, i32) {
    %c0_i32 = arith.constant 0 : i32
    %c0_i32_0 = arith.constant 0 : i32
    %c0_i32_1 = arith.constant 0 : i32
    return %c0_i32, %c0_i32_0 : i32, i32
  }
  func.func @transform_3(%arg0: i32, %arg1: memref<1xi32, #tpu.memory_space<smem>>) -> (i32, i32) {
    %c0_i32 = arith.constant 0 : i32
    %c0_i32_0 = arith.constant 0 : i32
    %c0_i32_1 = arith.constant 0 : i32
    return %c0_i32, %c0_i32_0 : i32, i32
  }
  func.func @transform_4(%arg0: i32, %arg1: memref<1xi32, #tpu.memory_space<smem>>) -> (i32, i32) {
    %c0_i32 = arith.constant 0 : i32
    %c0_i32_0 = arith.constant 0 : i32
    %c0_i32_1 = arith.constant 0 : i32
    return %c0_i32, %c0_i32_0 : i32, i32
  }
  func.func @transform_5(%arg0: i32, %arg1: memref<1xi32, #tpu.memory_space<smem>>) -> (i32, i32) {
    %c0_i32 = arith.constant 0 : i32
    %c0_i32_0 = arith.constant 0 : i32
    %c0_i32_1 = arith.constant 0 : i32
    return %c0_i32, %c0_i32_0 : i32, i32
  }
  func.func @transform_6(%arg0: i32, %arg1: memref<1xi32, #tpu.memory_space<smem>>) -> (i32, i32) {
    %c0_i32 = arith.constant 0 : i32
    %c0_i32_0 = arith.constant 0 : i32
    %c0_i32_1 = arith.constant 0 : i32
    return %c0_i32, %c0_i32_0 : i32, i32
  }
  func.func @transform_7(%arg0: i32, %arg1: memref<1xi32, #tpu.memory_space<smem>>) -> (i32, i32) {
    %c0_i32 = arith.constant 0 : i32
    %c0_i32_0 = arith.constant 0 : i32
    %c0_i32_1 = arith.constant 0 : i32
    return %c0_i32, %c0_i32_0 : i32, i32
  }
}

module attributes {stable_mosaic.version = 11 : i64} {
  func.func @_proj_kernel(%arg0: i32, %arg1: memref<8x128xbf16, #tpu.memory_space<vmem>>, %arg2: memref<128x128xbf16, #tpu.memory_space<vmem>>, %arg3: memref<1x128xf32, #tpu.memory_space<vmem>>, %arg4: memref<8x128xf32, #tpu.memory_space<vmem>>) attributes {dimension_semantics = [#tpu.dimension_semantics<parallel>], iteration_bounds = array<i64: 1>, scalar_prefetch = 0 : i64, scratch_operands = 0 : i64, tpu.core_type = #tpu.core_type<tc>, window_params = [{pipeline_mode = #tpu.pipeline_mode<synchronous>, transform_indices = @transform_0, window_bounds = array<i64: 8, 128>}, {transform_indices = @transform_1, window_bounds = array<i64: 128, 128>}, {transform_indices = @transform_2, window_bounds = array<i64: 1, 128>}, {transform_indices = @transform_3, window_bounds = array<i64: 8, 128>}]} {
    %c0 = arith.constant 0 : index
    %c0_0 = arith.constant 0 : index
    %0 = vector.load %arg1[%c0, %c0_0] : memref<8x128xbf16, #tpu.memory_space<vmem>>, vector<8x128xbf16>
    %c0_1 = arith.constant 0 : index
    %c0_2 = arith.constant 0 : index
    %1 = vector.load %arg2[%c0_1, %c0_2] : memref<128x128xbf16, #tpu.memory_space<vmem>>, vector<128x128xbf16>
    %cst = arith.constant dense<0.000000e+00> : vector<8x128xf32>
    %2 = tpu.matmul %0, %1, %cst {dimension_numbers = #tpu.dot_dimension_numbers<[1], [0], [0], [1], [0, 0, 1, 1], [], []>} : vector<8x128xbf16>, vector<128x128xbf16>, vector<8x128xf32> -> vector<8x128xf32>
    %c0_3 = arith.constant 0 : index
    %c0_4 = arith.constant 0 : index
    %3 = vector.load %arg3[%c0_3, %c0_4] : memref<1x128xf32, #tpu.memory_space<vmem>>, vector<1x128xf32>
    %4 = vector.broadcast %3 : vector<1x128xf32> to vector<8x128xf32>
    %5 = arith.addf %2, %4 : vector<8x128xf32>
    %c0_5 = arith.constant 0 : index
    %c0_6 = arith.constant 0 : index
    %6 = vector.load %arg4[%c0_5, %c0_6] : memref<8x128xf32, #tpu.memory_space<vmem>>, vector<8x128xf32>
    tpu.vector_store %arg4[%c0_5, %c0_6], %5 {strides = array<i32>} : memref<8x128xf32, #tpu.memory_space<vmem>>, vector<8x128xf32>,
    return
  }
  func.func @transform_0(%arg0: i32) -> (i32, i32) {
    %c0_i32 = arith.constant 0 : i32
    %c0_i32_0 = arith.constant 0 : i32
    %c0_i32_1 = arith.constant 0 : i32
    return %c0_i32, %c0_i32_0 : i32, i32
  }
  func.func @transform_1(%arg0: i32) -> (i32, i32) {
    %c0_i32 = arith.constant 0 : i32
    %c0_i32_0 = arith.constant 0 : i32
    return %c0_i32, %arg0 : i32, i32
  }
  func.func @transform_2(%arg0: i32) -> (i32, i32) {
    %c0_i32 = arith.constant 0 : i32
    %c0_i32_0 = arith.constant 0 : i32
    return %c0_i32, %arg0 : i32, i32
  }
  func.func @transform_3(%arg0: i32) -> (i32, i32) {
    %c0_i32 = arith.constant 0 : i32
    %c0_i32_0 = arith.constant 0 : i32
    return %c0_i32, %arg0 : i32, i32
  }
}

</mosaic_0001>

<bundles_post_ra>
// kernel: decoder_rnn_decode.3
= control target key start
LH: loop header
LB: loop body
LE: loop exit
PB: predicated region body
PF: predicated region fallthrough
CT: control target
= control target key end

     0   :  { %v180_v0 = vmov 0.0   ;;  %vm181_vm0 = vmmov 0   ;;  %s235_s1 = inlined_call_operand.vmem [shape: bf16[128,128], index: 1, kind: input, shape index: {}]   ;;  %s236_s0 = inlined_call_operand.vmem [shape: bf16[8,128], index: 0, kind: input, shape index: {}]   ;;  %s237_s2 = inlined_call_operand.vmem [shape: f32[1,128], index: 2, kind: input, shape index: {}]   ;;  %s238_s3 = inlined_call_operand.vmem [shape: f32[8,128], index: 3, kind: output, shape index: {}]  }
   0x1   :  { %150 = vmatprep.subr.bf16.mxu0 %v180_v0  ;;  %v172_v1 = vld [vmem:[%s235_s1] sm:$0xff]   ;;  %166 = vmatprep.mubr.msk.bf16.mxu0 %vm181_vm0, %v180_v0  ;;  %v173_v2 = vld [vmem:[%s235_s1 + $0x8] sm:$0xff]   ;;  %v174_v3 = vld [vmem:[%s235_s1 + $0x10] sm:$0xff]  }
   0x2   :  { %151 = vmatpush3.bf16.msra.mxu0 %v172_v1  ;;  %v175_v4 = vld [vmem:[%s235_s1 + $0x18] sm:$0xff]   ;;  %v176_v5 = vld [vmem:[%s235_s1 + $0x20] sm:$0xff]   ;;  %v177_v6 = vld [vmem:[%s235_s1 + $0x28] sm:$0xff]  }
   0x3   :  { %152 = vmatprep.subr.bf16.mxu0 %v180_v0  ;;  %v178_v7 = vld [vmem:[%s235_s1 + $0x30] sm:$0xff]   ;;  %v179_v8 = vld [vmem:[%s235_s1 + $0x38] sm:$0xff]   ;;  %v15_v9 = vld [vmem:[%s236_s0] sm:$0xf] }
   0x4   :  { %v132_v10 = vld [vmem:[%s237_s2] ss:$0 sm:$0xff] }
   0x6   :  { %153 = vmatpush3.bf16.msra.mxu0 %v173_v2 }
   0x7   :  { %154 = vmatprep.subr.bf16.mxu0 %v180_v0 }
   0xa   :  { %155 = vmatpush3.bf16.msra.mxu0 %v174_v3 }
   0xb   :  { %156 = vmatprep.subr.bf16.mxu0 %v180_v0 }
   0xe   :  { %157 = vmatpush3.bf16.msra.mxu0 %v175_v4 }
   0xf   :  { %158 = vmatprep.subr.bf16.mxu0 %v180_v0 }
  0x12   :  { %159 = vmatpush3.bf16.msra.mxu0 %v176_v5 }
  0x13   :  { %160 = vmatprep.subr.bf16.mxu0 %v180_v0 }
  0x16   :  { %161 = vmatpush3.bf16.msra.mxu0 %v177_v6 }
  0x17   :  { %162 = vmatprep.subr.bf16.mxu0 %v180_v0 }
  0x1a   :  { %163 = vmatpush3.bf16.msra.mxu0 %v178_v7 }
  0x1b   :  { %164 = vmatprep.subr.bf16.mxu0 %v180_v0 }
  0x1e   :  { %165 = vmatpush3.bf16.msra.mxu0 %v179_v8 }
  0x21   :  { %167 = vmatmul.mubr.bf16.vlgmr.msra.gmra.mrb[0].mxu0 %v15_v9 }
  0xf4   :  { %v121_v11 = vpop.f32.mrb[0].mxu0 }
  0xf5   :  { %v122_v12 = vadd.f32 %v132_v10, %v121_v11  ;;  %v168_v13 = vpop.f32.mrb[1].mxu0 }
  0xf6   :  { %v124_v14 = vpop.f32.mrb[2].mxu0 }
  0xf7   :  { %127 = vst [vmem:[%s238_s3] sm:$0xff] %v122_v12  ;;  %v169_v15 = vpop.f32.mrb[3].mxu0 }

// kernel: decoder_rnn_decode.2
= control target key start
LH: loop header
LB: loop body
LE: loop exit
PB: predicated region body
PF: predicated region fallthrough
CT: control target
= control target key end

     0   :  { %s1149_s0 = inlined_call_operand.<no memory space> [shape: s32[1], index: 0, kind: input, shape index: {}]   ;;  %s1150_s1 = inlined_call_operand.vmem [shape: f32[64,1,128], index: 1, kind: input, shape index: {}]   ;;  %s1151_s2 = inlined_call_operand.vmem [shape: bf16[128,384], index: 2, kind: input, shape index: {}]   ;;  %s1152_s3 = inlined_call_operand.vmem [shape: bf16[128,384], index: 3, kind: input, shape index: {}]   ;;  %s1153_s4 = inlined_call_operand.vmem [shape: f32[1,384], index: 4, kind: input, shape index: {}]   ;;  %s1154_s5 = inlined_call_operand.vmem [shape: f32[1,384], index: 5, kind: input, shape index: {}]   ;;  %s1155_s6 = inlined_call_operand.vmem [shape: f32[1,128], index: 6, kind: input, shape index: {}]   ;;  %s1156_s7 = inlined_call_operand.vmem [shape: f32[8,128], index: 7, kind: output, shape index: {0}]   ;;  %s1157_s8 = inlined_call_operand.vmem [shape: f32[1,128], index: 8, kind: output, shape index: {1}]  }
   0x1   :  { %s27_s9 = scalar_lea.vmem %s1150_s1, %s1149_s0 }
   0x2   :  { %v45_v0 = vld [vmem:[%s27_s9] sm:$0x1] }
   0x3   :  { %46 = vst [vmem:[#allocation2] sm:$0x1] %v45_v0 }
   0x4   :  { %71 = vsyncadd [#allocation5], 16 }
   0x5   :  { %902 = dma.done.wait [#allocation5], 16 }
   0x6   :  { %903 = vsyncadd [#allocation5], 4294967280  ;;  %v904_v1 = vmov 0.0   ;;  %v905_v2 = vmov 0   ;;  %vm906_vm0 = vmmov 0   ;;  %v114_v57 = vlaneseq }
   0x7   :  { %785 = vmatprep.subr.bf16.mxu1 %v904_v1  ;;  %632 = vst [vmem:[%s1156_s7 + $0x1] sm:$0x7f] %v904_v1  ;;  %76 = vst [vmem:[#allocation2 + $0x1] sm:$0x7f] %v904_v1  ;;  %289 = vmatprep.mubr.bf16.mxu0 %v905_v2  ;;  %v828_v3 = vld [vmem:[%s1151_s2 + $0x4] ss:$12 sps:$4 sm:$0xff]  }
   0x8   :  { %801 = vmatprep.mubr.msk.bf16.mxu1 %vm906_vm0, %v904_v1  ;;  %v830_v4 = vld [vmem:[%s1151_s2] ss:$12 sps:$4 sm:$0xff]   ;;  %257 = vmatprep.subr.bf16.mxu0 %v828_v3  ;;  %v831_v5 = vld [vmem:[%s1151_s2 + $0x8] ss:$12 sps:$4 sm:$0xff]   ;;  %v834_v7 = vld [vmem:[%s1151_s2 + $0x18] ss:$12 sps:$4 sm:$0xff]  }
   0x9   :  { %258 = vmatpush1.bf16.msra.mxu0 %v830_v4  ;;  %v832_v6 = vld [vmem:[%s1151_s2 + $0x1c] ss:$12 sps:$4 sm:$0xff]   ;;  %786 = vmatpush3.bf16.msra.mxu1 %v831_v5  ;;  %v835_v8 = vld [vmem:[%s1151_s2 + $0x20] ss:$12 sps:$4 sm:$0xff]   ;;  %v839_v11 = vld [vmem:[%s1151_s2 + $0x38] ss:$12 sps:$4 sm:$0xff]  }
   0xa   :  { %259 = vmatprep.subr.bf16.mxu0 %v832_v6  ;;  %787 = vmatprep.subr.bf16.mxu1 %v904_v1  ;;  %v836_v9 = vld [vmem:[%s1151_s2 + $0x34] ss:$12 sps:$4 sm:$0xff]   ;;  %v838_v10 = vld [vmem:[%s1151_s2 + $0x30] ss:$12 sps:$4 sm:$0xff]   ;;  %v840_v12 = vld [vmem:[%s1151_s2 + $0x4c] ss:$12 sps:$4 sm:$0xff]  }
   0xb   :  { %v842_v13 = vld [vmem:[%s1151_s2 + $0x48] ss:$12 sps:$4 sm:$0xff]   ;;  %v843_v14 = vld [vmem:[%s1151_s2 + $0x50] ss:$12 sps:$4 sm:$0xff]   ;;  %v846_v16 = vld [vmem:[%s1151_s2 + $0x60] ss:$12 sps:$4 sm:$0xff]  }
   0xc   :  { %v844_v15 = vld [vmem:[%s1151_s2 + $0x64] ss:$12 sps:$4 sm:$0xff]   ;;  %v847_v17 = vld [vmem:[%s1151_s2 + $0x68] ss:$12 sps:$4 sm:$0xff]   ;;  %v851_v20 = vld [vmem:[%s1151_s2 + $0x80] ss:$12 sps:$4 sm:$0xff]  }
   0xd   :  { %260 = vmatpush1.bf16.msra.mxu0 %v834_v7  ;;  %788 = vmatpush3.bf16.msra.mxu1 %v835_v8  ;;  %v848_v18 = vld [vmem:[%s1151_s2 + $0x7c] ss:$12 sps:$4 sm:$0xff]   ;;  %v850_v19 = vld [vmem:[%s1151_s2 + $0x78] ss:$12 sps:$4 sm:$0xff]   ;;  %v852_v21 = vld [vmem:[%s1151_s2 + $0x94] ss:$12 sps:$4 sm:$0xff]  }
   0xe   :  { %261 = vmatprep.subr.bf16.mxu0 %v836_v9  ;;  %789 = vmatprep.subr.bf16.mxu1 %v904_v1  ;;  %v854_v22 = vld [vmem:[%s1151_s2 + $0x90] ss:$12 sps:$4 sm:$0xff]   ;;  %v855_v23 = vld [vmem:[%s1151_s2 + $0x98] ss:$12 sps:$4 sm:$0xff]   ;;  %v858_v26 = vld [vmem:[%s1151_s2 + $0xa8] ss:$12 sps:$4 sm:$0xff]  }
   0xf   :  { %v77_v24 = vld [vmem:[#allocation2] sm:$0xff]  ;;  %v856_v25 = vld [vmem:[%s1151_s2 + $0xac] ss:$12 sps:$4 sm:$0xff]   ;;  %v859_v28 = vld [vmem:[%s1151_s2 + $0xb0] ss:$12 sps:$4 sm:$0xff]   ;;  %v115_v58 = vshrl.u32 %v114_v57, 7 }
  0x10   :  { %v78_v27 = vmax.f32 %v77_v24, 0.0  ;;  %v862_v29 = vld [vmem:[%s1152_s3 + $0x4] ss:$12 sps:$4 sm:$0xff]   ;;  %v860_v31 = vld [vmem:[%s1152_s3] ss:$12 sps:$4 sm:$0xff]  }
  0x11   :  { %262 = vmatpush1.bf16.msra.mxu0 %v838_v10  ;;  %790 = vmatpush3.bf16.msra.mxu1 %v839_v11  ;;  %v865_v32 = vld [vmem:[%s1152_s3 + $0x1c] ss:$12 sps:$4 sm:$0xff]   ;;  %v341_v33 = vld [vmem:[%s1155_s6] sm:$0x1]  ;;  %v863_v35 = vld [vmem:[%s1152_s3 + $0x18] ss:$12 sps:$4 sm:$0xff]  }
  0x12   :  { %263 = vmatprep.subr.bf16.mxu0 %v840_v12  ;;  %791 = vmatprep.subr.bf16.mxu1 %v904_v1  ;;  %v79_v30 = vpack.c.bf16 %v78_v27, %v78_v27  ;;  %v881_v34 = vld [vmem:[%s1152_s3 + $0x8] ss:$12 sps:$4 sm:$0xff]   ;;  %342 = vst [vmem:[#allocation4] sm:$0x1] %v341_v33  ;;  %v885_v37 = vld [vmem:[%s1152_s3 + $0x20] ss:$12 sps:$4 sm:$0xff]  }
  0x13   :  { %v868_v36 = vld [vmem:[%s1152_s3 + $0x34] ss:$12 sps:$4 sm:$0xff]   ;;  %v866_v38 = vld [vmem:[%s1152_s3 + $0x30] ss:$12 sps:$4 sm:$0xff]   ;;  %v871_v39 = vld [vmem:[%s1152_s3 + $0x4c] ss:$12 sps:$4 sm:$0xff]  }
  0x14   :  { %v886_v40 = vld [vmem:[%s1152_s3 + $0x38] ss:$12 sps:$4 sm:$0xff]   ;;  %v869_v41 = vld [vmem:[%s1152_s3 + $0x48] ss:$12 sps:$4 sm:$0xff]   ;;  %v887_v43 = vld [vmem:[%s1152_s3 + $0x50] ss:$12 sps:$4 sm:$0xff]  }
  0x15   :  { %264 = vmatpush1.bf16.msra.mxu0 %v842_v13  ;;  %792 = vmatpush3.bf16.msra.mxu1 %v843_v14  ;;  %v874_v42 = vld [vmem:[%s1152_s3 + $0x64] ss:$12 sps:$4 sm:$0xff]   ;;  %v872_v44 = vld [vmem:[%s1152_s3 + $0x60] ss:$12 sps:$4 sm:$0xff]   ;;  %v877_v45 = vld [vmem:[%s1152_s3 + $0x7c] ss:$12 sps:$4 sm:$0xff]  }
  0x16   :  { %265 = vmatprep.subr.bf16.mxu0 %v844_v15  ;;  %793 = vmatprep.subr.bf16.mxu1 %v904_v1  ;;  %v888_v46 = vld [vmem:[%s1152_s3 + $0x68] ss:$12 sps:$4 sm:$0xff]   ;;  %v875_v47 = vld [vmem:[%s1152_s3 + $0x78] ss:$12 sps:$4 sm:$0xff]   ;;  %v889_v49 = vld [vmem:[%s1152_s3 + $0x80] ss:$12 sps:$4 sm:$0xff]  }
  0x17   :  { %v880_v48 = vld [vmem:[%s1152_s3 + $0x94] ss:$12 sps:$4 sm:$0xff]   ;;  %v878_v50 = vld [vmem:[%s1152_s3 + $0x90] ss:$12 sps:$4 sm:$0xff]   ;;  %v884_v51 = vld [vmem:[%s1152_s3 + $0xac] ss:$12 sps:$4 sm:$0xff]  }
  0x18   :  { %v890_v52 = vld [vmem:[%s1152_s3 + $0x98] ss:$12 sps:$4 sm:$0xff]   ;;  %v882_v53 = vld [vmem:[%s1152_s3 + $0xa8] ss:$12 sps:$4 sm:$0xff]   ;;  %v891_v55 = vld [vmem:[%s1152_s3 + $0xb0] ss:$12 sps:$4 sm:$0xff]  }
  0x19   :  { %266 = vmatpush1.bf16.msra.mxu0 %v846_v16  ;;  %794 = vmatpush3.bf16.msra.mxu1 %v847_v17  ;;  %v1128_v54 = vld [vmem:[#allocation4] sm:$0x1]  ;;  %v116_v59 = vsub.s32 0, %v115_v58  ;;  %v120_v61 = vsub.s32 1, %v115_v58  ;;  %v124_v62 = vsub.s32 2, %v115_v58 }
  0x1a   :  { %267 = vmatprep.subr.bf16.mxu0 %v848_v18  ;;  %795 = vmatprep.subr.bf16.mxu1 %v904_v1  ;;  %v344_v56 = vpack.c.bf16 %v1128_v54, %v1128_v54  ;;  %v112_v60 = vld [vmem:[%s1153_s4] sm:$0x7] }
  0x1b   :  { %v117_v63 = vrot.slane %v112_v60, %v116_v59  ;;  %v121_v0 = vrot.slane %v112_v60, %v120_v61  ;;  %v377_v13 = vld [vmem:[%s1154_s5] sm:$0x7] }
  0x1c   :  { %v510_v14 = vrot.slane %v377_v13, %v116_v59  ;;  %v514_v15 = vrot.slane %v377_v13, %v120_v61 }
  0x1d   :  { %268 = vmatpush1.bf16.msra.mxu0 %v850_v19  ;;  %796 = vmatpush3.bf16.msra.mxu1 %v851_v20 }
  0x1e   :  { %269 = vmatprep.subr.bf16.mxu0 %v852_v21  ;;  %797 = vmatprep.subr.bf16.mxu1 %v904_v1 }
  0x21   :  { %270 = vmatpush1.bf16.msra.mxu0 %v854_v22  ;;  %798 = vmatpush3.bf16.msra.mxu1 %v855_v23 }
  0x22   :  { %271 = vmatprep.subr.bf16.mxu0 %v856_v25  ;;  %799 = vmatprep.subr.bf16.mxu1 %v904_v1 }
  0x25   :  { %272 = vmatpush1.bf16.msra.mxu0 %v858_v26  ;;  %800 = vmatpush3.bf16.msra.mxu1 %v859_v28 }
  0x26   :  { %522 = vmatprep.subr.bf16.mxu0 %v862_v29  ;;  %805 = vmatprep.subr.bf16.mxu1 %v904_v1 }
  0x28   :  { %290 = vmatmul.mubr.bf16.vlgmr.msra.gmra.mrb[0].mxu0 %v79_v30  ;;  %802 = vmatmul.mubr.bf16.vlgmr.msra.gmra.mrb[0].mxu1 %v79_v30 }
  0x29   :  { %523 = vmatpush1.bf16.msra.mxu0 %v860_v31  ;;  %806 = vmatpush3.bf16.msra.mxu1 %v881_v34  ;;  %v518_v34 = vrot.slane %v377_v13, %v124_v62 }
  0x2a   :  { %524 = vmatprep.subr.bf16.mxu0 %v865_v32  ;;  %807 = vmatprep.subr.bf16.mxu1 %v904_v1 }
  0x2b   :  { %554 = vmatprep.mubr.bf16.mxu0 %v905_v2  ;;  %821 = vmatprep.mubr.msk.bf16.mxu1 %vm906_vm0, %v904_v1  ;;  %v125_v2 = vrot.slane %v112_v60, %v124_v62 }
  0x2d   :  { %525 = vmatpush1.bf16.msra.mxu0 %v863_v35  ;;  %808 = vmatpush3.bf16.msra.mxu1 %v885_v37 }
  0x2e   :  { %526 = vmatprep.subr.bf16.mxu0 %v868_v36  ;;  %809 = vmatprep.subr.bf16.mxu1 %v904_v1 }
  0x31   :  { %527 = vmatpush1.bf16.msra.mxu0 %v866_v38  ;;  %810 = vmatpush3.bf16.msra.mxu1 %v886_v40 }
  0x32   :  { %528 = vmatprep.subr.bf16.mxu0 %v871_v39  ;;  %811 = vmatprep.subr.bf16.mxu1 %v904_v1 }
  0x35   :  { %529 = vmatpush1.bf16.msra.mxu0 %v869_v41  ;;  %812 = vmatpush3.bf16.msra.mxu1 %v887_v43 }
  0x36   :  { %530 = vmatprep.subr.bf16.mxu0 %v874_v42  ;;  %813 = vmatprep.subr.bf16.mxu1 %v904_v1 }
  0x39   :  { %531 = vmatpush1.bf16.msra.mxu0 %v872_v44  ;;  %814 = vmatpush3.bf16.msra.mxu1 %v888_v46 }
  0x3a   :  { %532 = vmatprep.subr.bf16.mxu0 %v877_v45  ;;  %815 = vmatprep.subr.bf16.mxu1 %v904_v1 }
  0x3d   :  { %533 = vmatpush1.bf16.msra.mxu0 %v875_v47  ;;  %816 = vmatpush3.bf16.msra.mxu1 %v889_v49 }
  0x3e   :  { %534 = vmatprep.subr.bf16.mxu0 %v880_v48  ;;  %817 = vmatprep.subr.bf16.mxu1 %v904_v1 }
  0x41   :  { %535 = vmatpush1.bf16.msra.mxu0 %v878_v50  ;;  %818 = vmatpush3.bf16.msra.mxu1 %v890_v52 }
  0x42   :  { %536 = vmatprep.subr.bf16.mxu0 %v884_v51  ;;  %819 = vmatprep.subr.bf16.mxu1 %v904_v1 }
  0x45   :  { %537 = vmatpush1.bf16.msra.mxu0 %v882_v53  ;;  %820 = vmatpush3.bf16.msra.mxu1 %v891_v55 }
  0x48   :  { %555 = vmatmul.mubr.bf16.vlgmr.msra.gmra.mrb[4].mxu0 %v344_v56  ;;  %822 = vmatmul.mubr.bf16.vlgmr.msra.gmra.mrb[4].mxu1 %v344_v56 }
  0xfb   :  { %v291_v1 = vpop.f32.mrb[0].mxu0  ;;  %v332_v5 = vpop.f32.mrb[0].mxu1 }
  0xfc   :  { %v292_v3 = vadd.f32 %v291_v1, %v117_v63  ;;  %v293_v4 = vpop.f32.mrb[1].mxu0  ;;  %v333_v7 = vadd.f32 %v332_v5, %v125_v2  ;;  %v803_v9 = vpop.f32.mrb[1].mxu1 }
  0xfd   :  { %v294_v6 = vadd.f32 %v293_v4, %v121_v0  ;;  %v295_v8 = vpop.f32.mrb[2].mxu0  ;;  %v335_v11 = vpop.f32.mrb[2].mxu1 }
  0xfe   :  { %338 = vst [vmem:[#allocation3] sm:$0xff] %v292_v3  ;;  %v296_v10 = vpop.f32.mrb[3].mxu0  ;;  %340 = vst [vmem:[#allocation3 + $0x10] sm:$0xff] %v333_v7  ;;  %v804_v12 = vpop.f32.mrb[3].mxu1 }
  0xff   :  { %339 = vst [vmem:[#allocation3 + $0x8] sm:$0xff] %v294_v6 }
 0x106   :  { %v603_v18 = vld [vmem:[#allocation3] ss:$8 sm:$0x7] }
 0x107   :  { %v612_v27 = vrot.slane %v603_v18, 1  ;;  %v622_v40 = vrot.slane %v603_v18, 2 }
 0x11b   :  { %v556_v16 = vpop.f32.mrb[4].mxu0  ;;  %v597_v20 = vpop.f32.mrb[4].mxu1 }
 0x11c   :  { %v557_v17 = vadd.f32 %v556_v16, %v510_v14  ;;  %v558_v19 = vpop.f32.mrb[5].mxu0  ;;  %v823_v23 = vpop.f32.mrb[5].mxu1  ;;  %v598_v37 = vadd.f32 %v597_v20, %v518_v34 }
 0x11d   :  { %v559_v21 = vadd.f32 %v558_v19, %v514_v15  ;;  %v560_v22 = vpop.f32.mrb[6].mxu0  ;;  %v600_v26 = vpop.f32.mrb[6].mxu1 }
 0x11e   :  { %v604_v24 = vadd.f32 %v603_v18, %v557_v17  ;;  %v561_v25 = vpop.f32.mrb[7].mxu0  ;;  %v824_v28 = vpop.f32.mrb[7].mxu1 }
 0x11f   :  { %v614_v30 = vadd.f32 %v612_v27, %v559_v21 }
 0x120   :  { %v757_v29 = vmul.f32 -1.442695, %v604_v24 }
 0x121   :  { %v758_v31 = vmul.f32 -1.442695, %v614_v30 }
 0x122   :  { %892 = vpow2.f32 %v757_v29 }
 0x123   :  { %894 = vpow2.f32 %v758_v31 }
 0x12c   :  { %v893_v32 = vpop.eup %892 }
 0x12d   :  { %v608_v33 = vadd.f32 1.0, %v893_v32  ;;  %v895_v35 = vpop.eup %894 }
 0x12e   :  { %v618_v36 = vadd.f32 1.0, %v895_v35 }
 0x12f   :  { %896 = vrcp.f32 %v608_v33 }
 0x130   :  { %898 = vrcp.f32 %v618_v36 }
 0x139   :  { %v897_v38 = vpop.eup %896 }
 0x13a   :  { %v621_v39 = vmul.f32 %v897_v38, %v598_v37  ;;  %v899_v42 = vpop.eup %898 }
 0x13b   :  { %v626_v43 = vsub.f32 1.0, %v899_v42  ;;  %v628_v45 = vmul.f32 %v899_v42, %v1128_v54 }
 0x13c   :  { %v624_v41 = vadd.f32 %v622_v40, %v621_v39 }
 0x13e   :  { %900 = vtanh.f32 %v624_v41 }
 0x148   :  { %v901_v44 = vpop.eup %900 }
 0x149   :  { %v627_v46 = vmul.f32 %v901_v44, %v626_v43 }
 0x14b   :  { %v629_v47 = vadd.f32 %v628_v45, %v627_v46 }
 0x14d   :  { %630 = vst [vmem:[#allocation4] sm:$0x1] %v629_v47  ;;  %631 = vst [vmem:[%s1156_s7] sm:$0x1] %v629_v47 }
 0x154   :  { %v633_v48 = vld [vmem:[#allocation4] sm:$0x1] }
 0x155   :  { %634 = vst [vmem:[%s1157_s8] sm:$0x1] %v633_v48 }
 0x156   :  { %643 = vsyncmov [#allocation5] }
 0x159   :  { %s644_s13 = vpop.sfrf %643 }
 0x15a   :  { %p759_p0 = scmp.ne.s32.totalorder %s644_s13, 0 }
 0x15c   :  { %648 = shalt.err (%p759_p0)  }
 0x15d   :  { %650 = vsyncmov [#allocation5 + $0x1] }
 0x160   :  { %s651_s14 = vpop.sfrf %650 }
 0x161   :  { %p760_p1 = scmp.ne.s32.totalorder %s651_s14, 0 }
 0x163   :  { %655 = shalt.err (%p760_p1)  }
 0x164   :  { %657 = vsyncmov [#allocation5 + $0x2] }
 0x167   :  { %s658_s15 = vpop.sfrf %657 }
 0x168   :  { %p761_p2 = scmp.ne.s32.totalorder %s658_s15, 0 }
 0x16a   :  { %662 = shalt.err (%p761_p2)  }
 0x16b   :  { %664 = vsyncmov [#allocation5 + $0x3] }
 0x16e   :  { %s665_s16 = vpop.sfrf %664 }
 0x16f   :  { %p762_p3 = scmp.ne.s32.totalorder %s665_s16, 0 }
 0x171   :  { %669 = shalt.err (%p762_p3)  }
 0x172   :  { %671 = vsyncmov [#allocation5 + $0x4] }
 0x175   :  { %s672_s7 = vpop.sfrf %671 }
 0x176   :  { %p763_p4 = scmp.ne.s32.totalorder %s672_s7, 0 }
 0x178   :  { %676 = shalt.err (%p763_p4)  }
 0x179   :  { %678 = vsyncmov [#allocation5 + $0x5] }
 0x17c   :  { %s679_s8 = vpop.sfrf %678 }
 0x17d   :  { %p764_p5 = scmp.ne.s32.totalorder %s679_s8, 0 }
 0x17f   :  { %683 = shalt.err (%p764_p5)  }
 0x180   :  { %685 = vsyncmov [#allocation5 + $0x6] }
 0x183   :  { %s686_s2 = vpop.sfrf %685 }
 0x184   :  { %p765_p6 = scmp.ne.s32.totalorder %s686_s2, 0 }
 0x186   :  { %690 = shalt.err (%p765_p6)  }
 0x187   :  { %692 = vsyncmov [#allocation5 + $0x7] }
 0x18a   :  { %s693_s17 = vpop.sfrf %692 }
 0x18b   :  { %p766_p7 = scmp.ne.s32.totalorder %s693_s17, 0 }
 0x18d   :  { %697 = shalt.err (%p766_p7)  }

</bundles_post_ra>
